<compile_context>
chip_gen: v7x
topology: tpu7x:2x2x1
jax: 0.10.0
libtpu: 0.0.40
codegen_flags: <defaults>
</compile_context>

<pallas_src>
import functools

import jax
import jax.numpy as jnp
from jax.experimental import pallas as pl
from jax.experimental.pallas import tpu as pltpu


# ----------------------------------------------------------------------------
# Pallas kernel: full MLP forward, feature-major, batch on the lane axis
# ----------------------------------------------------------------------------
def _mlp_kernel(*refs, out_sizes):
    # refs = (x_ref, w_0, ..., w_{L-1}, b_packed_ref, out_ref)
    #   x_ref : (input_size, TB)      bf16   (streamed per batch tile)
    #   w_k   : (out_k, in_k)         bf16   (VMEM-resident, PyTorch layout)
    #   b_ref : (sum(out_k), 1)       f32    (VMEM-resident, packed biases)
    #   out   : (output_size, TB)     f32
    x_ref = refs[0]
    out_ref = refs[-1]
    b_ref = refs[-2]
    w_refs = refs[1:-2]
    n_layers = len(w_refs)

    h = x_ref[...]                                        # (in, TB), bf16
    off = 0
    for k in range(n_layers):
        # (out_k, in_k) @ (in_k, TB) -> (out_k, TB); f32 accumulation on MXU.
        acc = jnp.dot(w_refs[k][...], h, preferred_element_type=jnp.float32)
        # f32 bias (out_k, 1) broadcast over the lane (batch) axis.
        acc = acc + b_ref[off:off + out_sizes[k], :]
        off += out_sizes[k]
        if k < n_layers - 1:
            # ReLU in f32 (v5e has no bf16 VPU); downcast only for next matmul.
            h = jnp.maximum(acc, 0.0).astype(h.dtype)
        else:
            out_ref[...] = acc.astype(out_ref.dtype)


# ----------------------------------------------------------------------------
# Wrapper: lane-dense layout, batch-tiled grid, weights VMEM-resident
# ----------------------------------------------------------------------------
def regularized_regression_forward(x, params, *, batch_tile=512,
                                   mxu_dtype=jnp.bfloat16):
    """Forward pass of the MLP.

    x:      (batch, input_size) float32            (PyTorch layout)
    params: list of (W, b); W: (out_k, in_k), b: (out_k,)  (nn.Linear layout)
    returns (batch, output_size) float32
    """
    batch, input_size = x.shape
    output_size = params[-1][0].shape[0]
    out_sizes = tuple(int(w.shape[0]) for w, _ in params)

    # Batch tile: multiple of 128 (full lane width), capped at `batch_tile`.
    tb = min(batch_tile, max(128, pl.cdiv(batch, 128) * 128))
    tb = max(128, (tb // 128) * 128)
    padded = pl.cdiv(batch, tb) * tb
    n_tiles = padded // tb

    # Feature-major, lane-dense input: (input_size, padded_batch), bf16.
    xt = jnp.pad(x, ((0, padded - batch), (0, 0))).T.astype(mxu_dtype)

    weights = [w.astype(mxu_dtype) for w, _ in params]
    # Pack all biases into one (sum(out_k), 1) f32 array -> single DMA/tile.
    b_packed = jnp.concatenate(
        [b.reshape(-1, 1) for _, b in params], axis=0).astype(jnp.float32)

    in_specs = [pl.BlockSpec((input_size, tb), lambda i: (0, i))]        # stream x
    in_specs += [pl.BlockSpec(w.shape, lambda i: (0, 0)) for w in weights]  # resident
    in_specs += [pl.BlockSpec(b_packed.shape, lambda i: (0, 0))]            # resident

    out_spec = pl.BlockSpec((output_size, tb), lambda i: (0, i))

    kernel = functools.partial(_mlp_kernel, out_sizes=out_sizes)

    # VMEM use per step: 2 x (32xTB bf16 + 8xTB f32) + ~20 KB params — far under
    # even v7x's 32 MiB scoped default, so no vmem_limit override is needed.
    out_t = pl.pallas_call(
        kernel,
        out_shape=jax.ShapeDtypeStruct((output_size, padded), jnp.float32),
        grid=(n_tiles,),
        in_specs=in_specs,
        out_specs=out_spec,
        compiler_params=pltpu.CompilerParams(
            dimension_semantics=("parallel",),   # shard batch tiles across TCs
        ),
    )(xt, *weights, b_packed)

    # Layout plumbing only (outside the kernel): back to (batch, output_size).
    return out_t[:, :batch].T


# ----------------------------------------------------------------------------
# Deterministic parameter init (mirrors nn.Linear: U(-1/sqrt(in), +1/sqrt(in)))
# PyTorch layout: W (out, in), b (out,)
# ----------------------------------------------------------------------------
def init_params(key, input_size, hidden_sizes, output_size):
    sizes = [input_size] + list(hidden_sizes) + [output_size]
    params = []
    for i in range(len(sizes) - 1):
        fan_in, fan_out = sizes[i], sizes[i + 1]
        bound = 1.0 / (fan_in ** 0.5)
        key, kw, kb = jax.random.split(key, 3)
        w = jax.random.uniform(kw, (fan_out, fan_in), jnp.float32, -bound, bound)
        b = jax.random.uniform(kb, (fan_out,), jnp.float32, -bound, bound)
        params.append((w, b))
    return params


def reference_forward(x, params, compute_dtype=jnp.float32):
    """Pure-JAX reference; compute_dtype=bfloat16 mirrors the kernel precision."""
    h = x.astype(compute_dtype)
    for i, (w, b) in enumerate(params):
        h = jnp.dot(h, w.T.astype(compute_dtype),
                    preferred_element_type=jnp.float32) + b
        if i < len(params) - 1:
            h = jnp.maximum(h, 0.0).astype(compute_dtype)
    return h


if __name__ == "__main__":
    # RegularizedRegressionModel(32, [64, 32], 8); batch sized so the grid has
    # two lane-dense 512-row tiles (parallel across TCs where available).
    input_size = 32
    hidden_sizes = [64, 32]
    output_size = 8
    batch = 1024

    key = jax.random.PRNGKey(0)
    key, kx = jax.random.split(key)
    x = jax.random.normal(kx, (batch, input_size), jnp.float32)
    params = init_params(key, input_size, hidden_sizes, output_size)

    out = regularized_regression_forward(x, params)
    out = jax.block_until_ready(out)

    assert out.shape == (batch, output_size)

    # Check against a precision-matched (bf16 operands, f32 accum) reference...
    ref_bf16 = reference_forward(x, params, jnp.bfloat16)
    assert jnp.allclose(out, ref_bf16, atol=1e-2, rtol=1e-2), \
        "mismatch vs bf16-precision JAX reference"
    # ...and loosely against the pure-f32 reference (bf16 rounding budget).
    ref_f32 = reference_forward(x, params, jnp.float32)
    assert jnp.allclose(out, ref_f32, atol=5e-2, rtol=5e-2), \
        "mismatch vs f32 JAX reference"

    print("KERNEL_OK")
</pallas_src>

<mosaic_0001>
module attributes {stable_mosaic.version = 11 : i64} {
  func.func @_mlp_kernel(%arg0: i32, %arg1: memref<32x512xbf16, #tpu.memory_space<vmem>>, %arg2: memref<64x32xbf16, #tpu.memory_space<vmem>>, %arg3: memref<32x64xbf16, #tpu.memory_space<vmem>>, %arg4: memref<8x32xbf16, #tpu.memory_space<vmem>>, %arg5: memref<104x1xf32, #tpu.memory_space<vmem>>, %arg6: memref<8x512xf32, #tpu.memory_space<vmem>>) attributes {dimension_semantics = [#tpu.dimension_semantics<parallel>], iteration_bounds = array<i64: 2>, scalar_prefetch = 0 : i64, scratch_operands = 0 : i64, tpu.core_type = #tpu.core_type<tc>, window_params = [{transform_indices = @transform_0, window_bounds = array<i64: 32, 512>}, {pipeline_mode = #tpu.pipeline_mode<synchronous>, transform_indices = @transform_1, window_bounds = array<i64: 64, 32>}, {pipeline_mode = #tpu.pipeline_mode<synchronous>, transform_indices = @transform_2, window_bounds = array<i64: 32, 64>}, {pipeline_mode = #tpu.pipeline_mode<synchronous>, transform_indices = @transform_3, window_bounds = array<i64: 8, 32>}, {pipeline_mode = #tpu.pipeline_mode<synchronous>, transform_indices = @transform_4, window_bounds = array<i64: 104, 1>}, {transform_indices = @transform_5, window_bounds = array<i64: 8, 512>}]} {
    %c0 = arith.constant 0 : index
    %c0_0 = arith.constant 0 : index
    %0 = vector.load %arg1[%c0, %c0_0] : memref<32x512xbf16, #tpu.memory_space<vmem>>, vector<32x512xbf16>
    %c0_1 = arith.constant 0 : index
    %c0_2 = arith.constant 0 : index
    %1 = vector.load %arg2[%c0_1, %c0_2] : memref<64x32xbf16, #tpu.memory_space<vmem>>, vector<64x32xbf16>
    %cst = arith.constant dense<0.000000e+00> : vector<64x512xf32>
    %2 = tpu.matmul %1, %0, %cst {dimension_numbers = #tpu.dot_dimension_numbers<[1], [0], [0], [1], [0, 0, 1, 1], [], []>} : vector<64x32xbf16>, vector<32x512xbf16>, vector<64x512xf32> -> vector<64x512xf32>
    %c0_3 = arith.constant 0 : index
    %c0_4 = arith.constant 0 : index
    %3 = vector.load %arg5[%c0_3, %c0_4] : memref<104x1xf32, #tpu.memory_space<vmem>>, vector<64x1xf32>
    %4 = vector.broadcast %3 : vector<64x1xf32> to vector<64x512xf32>
    %5 = arith.addf %2, %4 : vector<64x512xf32>
    %cst_5 = arith.constant 0.000000e+00 : f32
    %6 = vector.broadcast %cst_5 : f32 to vector<64x512xf32>
    %7 = arith.maximumf %5, %6 : vector<64x512xf32>
    %8 = arith.truncf %7 : vector<64x512xf32> to vector<64x512xbf16>
    %c0_6 = arith.constant 0 : index
    %c0_7 = arith.constant 0 : index
    %9 = vector.load %arg3[%c0_6, %c0_7] : memref<32x64xbf16, #tpu.memory_space<vmem>>, vector<32x64xbf16>
    %cst_8 = arith.constant dense<0.000000e+00> : vector<32x512xf32>
    %10 = tpu.matmul %9, %8, %cst_8 {dimension_numbers = #tpu.dot_dimension_numbers<[1], [0], [0], [1], [0, 0, 1, 1], [], []>} : vector<32x64xbf16>, vector<64x512xbf16>, vector<32x512xf32> -> vector<32x512xf32>
    %c64 = arith.constant 64 : index
    %c0_9 = arith.constant 0 : index
    %11 = vector.load %arg5[%c64, %c0_9] : memref<104x1xf32, #tpu.memory_space<vmem>>, vector<32x1xf32>
    %12 = vector.broadcast %11 : vector<32x1xf32> to vector<32x512xf32>
    %13 = arith.addf %10, %12 : vector<32x512xf32>
    %cst_10 = arith.constant 0.000000e+00 : f32
    %14 = vector.broadcast %cst_10 : f32 to vector<32x512xf32>
    %15 = arith.maximumf %13, %14 : vector<32x512xf32>
    %16 = arith.truncf %15 : vector<32x512xf32> to vector<32x512xbf16>
    %c0_11 = arith.constant 0 : index
    %c0_12 = arith.constant 0 : index
    %17 = vector.load %arg4[%c0_11, %c0_12] : memref<8x32xbf16, #tpu.memory_space<vmem>>, vector<8x32xbf16>
    %cst_13 = arith.constant dense<0.000000e+00> : vector<8x512xf32>
    %18 = tpu.matmul %17, %16, %cst_13 {dimension_numbers = #tpu.dot_dimension_numbers<[1], [0], [0], [1], [0, 0, 1, 1], [], []>} : vector<8x32xbf16>, vector<32x512xbf16>, vector<8x512xf32> -> vector<8x512xf32>
    %c96 = arith.constant 96 : index
    %c0_14 = arith.constant 0 : index
    %19 = vector.load %arg5[%c96, %c0_14] : memref<104x1xf32, #tpu.memory_space<vmem>>, vector<8x1xf32>
    %20 = vector.broadcast %19 : vector<8x1xf32> to vector<8x512xf32>
    %21 = arith.addf %18, %20 : vector<8x512xf32>
    %c0_15 = arith.constant 0 : index
    %c0_16 = arith.constant 0 : index
    %22 = vector.load %arg6[%c0_15, %c0_16] : memref<8x512xf32, #tpu.memory_space<vmem>>, vector<8x512xf32>
    tpu.vector_store %arg6[%c0_15, %c0_16], %21 {strides = array<i32>} : memref<8x512xf32, #tpu.memory_space<vmem>>, vector<8x512xf32>,
    return
  }
  func.func @transform_0(%arg0: i32) -> (i32, i32) {
    %c0_i32 = arith.constant 0 : i32
    %c0_i32_0 = arith.constant 0 : i32
    return %c0_i32, %arg0 : i32, i32
  }
  func.func @transform_1(%arg0: i32) -> (i32, i32) {
    %c0_i32 = arith.constant 0 : i32
    %c0_i32_0 = arith.constant 0 : i32
    %c0_i32_1 = arith.constant 0 : i32
    return %c0_i32, %c0_i32_0 : i32, i32
  }
  func.func @transform_2(%arg0: i32) -> (i32, i32) {
    %c0_i32 = arith.constant 0 : i32
    %c0_i32_0 = arith.constant 0 : i32
    %c0_i32_1 = arith.constant 0 : i32
    return %c0_i32, %c0_i32_0 : i32, i32
  }
  func.func @transform_3(%arg0: i32) -> (i32, i32) {
    %c0_i32 = arith.constant 0 : i32
    %c0_i32_0 = arith.constant 0 : i32
    %c0_i32_1 = arith.constant 0 : i32
    return %c0_i32, %c0_i32_0 : i32, i32
  }
  func.func @transform_4(%arg0: i32) -> (i32, i32) {
    %c0_i32 = arith.constant 0 : i32
    %c0_i32_0 = arith.constant 0 : i32
    %c0_i32_1 = arith.constant 0 : i32
    return %c0_i32, %c0_i32_0 : i32, i32
  }
  func.func @transform_5(%arg0: i32) -> (i32, i32) {
    %c0_i32 = arith.constant 0 : i32
    %c0_i32_0 = arith.constant 0 : i32
    return %c0_i32, %arg0 : i32, i32
  }
}

</mosaic_0001>

<bundles_post_ra>
// kernel: tpu_custom_call.1
= control target key start
LH: loop header
LB: loop body
LE: loop exit
PB: predicated region body
PF: predicated region fallthrough
CT: control target
= control target key end

     0   :  { %10 = vsyncpa [#allocation4], 0  ;;  %s1338_s0 = inlined_call_operand.vmem [shape: bf16[32,1024], index: 0, kind: input, shape index: {}]   ;;  %s1339_s1 = inlined_call_operand.vmem [shape: bf16[64,32], index: 1, kind: input, shape index: {}]   ;;  %s1340_s2 = inlined_call_operand.vmem [shape: bf16[32,64], index: 2, kind: input, shape index: {}]   ;;  %s1341_s3 = inlined_call_operand.vmem [shape: bf16[8,32], index: 3, kind: input, shape index: {}]   ;;  %s1342_s4 = inlined_call_operand.vmem [shape: f32[104,1], index: 4, kind: input, shape index: {}]   ;;  %s1343_s5 = inlined_call_operand.hbm [shape: f32[8,1024], index: 5, kind: output, shape index: {}]  }
   0x1   :  { %12 = vsyncpa [#allocation4 + $0x1], 0  ;;  %s1142_s18 = smov 0   ;;  %s1144_s19 = smov 0  }
   0x2   :  { %s1146_s20 = smov 0   ;;  %s1148_s21 = smov 0  }
   0x3 LB: > { %s941_s22 = sadd.s32 4294967295, %s1108_s21   ;;  %s942_s23 = sadd.s32 4294967294, %s1108_s21   ;;  %s1108_s21 = sphi %s1148_s21, %s1349_s21   ;;  %s1104_s20 = sphi %s1146_s20, %s1348_s20   ;;  %s1100_s19 = sphi %s1144_s19, %s1347_s19   ;;  %s1096_s18 = sphi %s1142_s18, %s1346_s18  }
   0x4   : > { %s1165_s24 = sadd.s32 1, %s1108_s21   ;;  %s25_s25 = sadd.s32 1, %s1104_s20 }
   0x5   : > { %s22_s26 = ssub.s32 %s1108_s21, %s1165_s24  ;;  %p32_p0 = scmp.ne.s32.totalorder %s1104_s20, %s1100_s19 }
   0x6   : > { %p23_p1 = scmp.eq.s32.totalorder %s22_s26, 0  ;;  %p33_p2 = scmp.eq.s32.totalorder %s1108_s21, 0 }
   0x7   : > { %p146_p3 = scmp.eq.s32.totalorder %s941_s22, 1  ;;  %p151_p4 = scmp.ne.s32.totalorder %s1100_s19, %s1096_s18 }
   0x8   : > { %s1178_s27 = scalar_select %p23_p1, %s1104_s20, %s25_s25  }
   0x9   : > { %p34_p5 = por %p33_p2, %p32_p0  ;;  %p1180_p6 = por %p146_p3, %p32_p0 }
   0xa   : > { %p152_p7 = scmp.eq.s32.totalorder %s942_s23, 1  ;;  %p944_p9 = scmp.ge.s32.totalorder %s1108_s21, 2 }
   0xc   : > { %p1184_p8 = por %p152_p7, %p151_p4  ;;  %180 = sbr.rel (%p944_p9) target bundleno = 27 (0x1b), region = 32 }
  0x13   : > { %183 = sbr.rel (!%p34_p5) target bundleno = 27 (0x1b), region = 36  ;;  %s185_s30 = sand.u32 (%p34_p5), 1, %s1104_s20  }
  0x14   : > { %s984_s6 = sshll.u32 (%p34_p5), %s1108_s21, 4  ;;  %s945_s7 = sshll.u32 (%p34_p5), %s185_s30, 6 }
  0x15   : > { %s190_s10 = scalar_lea.vmem (%p34_p5), %s1338_s0, %s984_s6  ;;  %s187_s11 = scalar_lea.vmem (%p34_p5), [#allocation2], %s945_s7 }
  0x16   : > { %v203_v0 = vld [vmem:[%s190_s10] sm:$0xff] (%p34_p5)  ;;  %v205_v1 = vld [vmem:[%s190_s10 + $0x8] sm:$0xff] (%p34_p5) }
  0x17   : > { %v207_v2 = vld [vmem:[%s190_s10 + $0x20] sm:$0xff] (%p34_p5)  ;;  %204 = vst [vmem:[%s187_s11] sm:$0xff] (%p34_p5), %v203_v0  ;;  %206 = vst [vmem:[%s187_s11 + $0x8] sm:$0xff] (%p34_p5), %v205_v1  ;;  %v209_v3 = vld [vmem:[%s190_s10 + $0x28] sm:$0xff] (%p34_p5) }
  0x18   : > { %208 = vst [vmem:[%s187_s11 + $0x10] sm:$0xff] (%p34_p5), %v207_v2  ;;  %v211_v4 = vld [vmem:[%s190_s10 + $0x40] sm:$0xff] (%p34_p5)  ;;  %v213_v5 = vld [vmem:[%s190_s10 + $0x48] sm:$0xff] (%p34_p5)  ;;  %210 = vst [vmem:[%s187_s11 + $0x18] sm:$0xff] (%p34_p5), %v209_v3 }
  0x19   : > { %212 = vst [vmem:[%s187_s11 + $0x20] sm:$0xff] (%p34_p5), %v211_v4  ;;  %214 = vst [vmem:[%s187_s11 + $0x28] sm:$0xff] (%p34_p5), %v213_v5  ;;  %v215_v6 = vld [vmem:[%s190_s10 + $0x60] sm:$0xff] (%p34_p5)  ;;  %v217_v7 = vld [vmem:[%s190_s10 + $0x68] sm:$0xff] (%p34_p5) }
  0x1a   : > { %216 = vst [vmem:[%s187_s11 + $0x30] sm:$0xff] %v215_v6  ;;  %218 = vst [vmem:[%s187_s11 + $0x38] sm:$0xff] %v217_v7 }
  0x1b PF: > { %p948_p10 = scmp.ge.s32.totalorder %s1108_s21, 1  ;;  %p223_p11 = scmp.lt.s32.totalorder %s1108_s21, 3 }
  0x1d   : > { %p224_p12 = pnand %p948_p10, %p223_p11 }
  0x1e   : > { %s1199_s12 = sand.u32 (!%p224_p12), 1, %s1100_s19   ;;  %v1110_v8 = vmov (!%p224_p12), 0   ;;  %v276_v17 = vld [vmem:[%s1342_s4] sm:$0xff] (!%p224_p12)  ;;  %v278_v19 = vld [vmem:[%s1342_s4 + $0x10] sm:$0xff] (!%p224_p12)  ;;  %vm384_vm0 = vcmask (!%p224_p12), 261120   ;;  %v277_v20 = vld [vmem:[%s1342_s4 + $0x8] sm:$0xff] (!%p224_p12) }
  0x1f   : > { %227 = sbr.rel (%p224_p12) target bundleno = 753 (0x2f1), region = 59  ;;  %s949_s13 = sshll.u32 (!%p224_p12), %s1199_s12, 6  ;;  %429 = vmatprep.mubr.bf16.mxu0 (!%p224_p12), %v1110_v8  ;;  %502 = vmatprep.mubr.bf16.mxu1 (!%p224_p12), %v1110_v8  ;;  %v1040_v18 = vld [vmem:[%s1339_s1] sm:$0xff] (!%p224_p12)   ;;  %v279_v21 = vld [vmem:[%s1342_s4 + $0x18] sm:$0xff] (!%p224_p12)  ;;  %v281_v23 = vld [vmem:[%s1342_s4 + $0x28] sm:$0xff] (!%p224_p12)  ;;  %vm629_vm1 = vcmask (!%p224_p12), 523264  }
  0x20   : > { %1026 = vset.pattern.permute.xlu0 (!%p224_p12), %v1110_v8  ;;  %1027 = vset.pattern.permute.xlu1 (!%p224_p12), %v1110_v8  ;;  %s232_s14 = scalar_lea.vmem (!%p224_p12), [#allocation2], %s949_s13  ;;  %v280_v22 = vld [vmem:[%s1342_s4 + $0x20] sm:$0xff] (!%p224_p12)  ;;  %v1041_v24 = vld [vmem:[%s1339_s1 + $0x8] sm:$0xff] (!%p224_p12)   ;;  %v282_v25 = vld [vmem:[%s1342_s4 + $0x30] sm:$0xff] (!%p224_p12)  ;;  %s950_s9 = sshll.u32 (!%p224_p12), %s1199_s12, 5 }
  0x21   : > { %v1028_v9 = vld [vmem:[%s232_s14 + $0x4] ss:$16 sps:$4 sm:$0xff] (!%p224_p12)   ;;  %v1030_v10 = vld [vmem:[%s232_s14 + $0xc] ss:$16 sps:$4 sm:$0xff] (!%p224_p12)   ;;  %v1032_v11 = vld [vmem:[%s232_s14] ss:$16 sps:$4 sm:$0xff] (!%p224_p12)   ;;  %286 = vperm.xlu0 (!%p224_p12), %1026, %v276_v17   ;;  %296 = vperm.xlu1 (!%p224_p12), %1027, %v278_v19  }
  0x22   : > { %397 = vmatprep.subr.bf16.mxu0 (!%p224_p12), %v1028_v9  ;;  %v1033_v12 = vld [vmem:[%s232_s14 + $0x8] ss:$16 sps:$4 sm:$0xff] (!%p224_p12)   ;;  %470 = vmatprep.subr.bf16.mxu1 (!%p224_p12), %v1030_v10  ;;  %v1034_v13 = vld [vmem:[%s232_s14 + $0x24] ss:$16 sps:$4 sm:$0xff] (!%p224_p12)   ;;  %v1036_v14 = vld [vmem:[%s232_s14 + $0x2c] ss:$16 sps:$4 sm:$0xff] (!%p224_p12)  }
  0x23   : > { %398 = vmatpush1.bf16.msra.mxu0 (!%p224_p12), %v1032_v11  ;;  %471 = vmatpush1.bf16.msra.mxu1 (!%p224_p12), %v1033_v12  ;;  %v1038_v15 = vld [vmem:[%s232_s14 + $0x20] ss:$16 sps:$4 sm:$0xff] (!%p224_p12)   ;;  %v1039_v16 = vld [vmem:[%s232_s14 + $0x28] ss:$16 sps:$4 sm:$0xff] (!%p224_p12)   ;;  %s985_s10 = sshll.u32 (!%p224_p12), %s941_s22, 9  ;;  %s256_s11 = scalar_lea.vmem (!%p224_p12), [#allocation3], %s950_s9 }
  0x24   : > { %399 = vmatprep.subr.bf16.mxu0 (!%p224_p12), %v1034_v13  ;;  %472 = vmatprep.subr.bf16.mxu1 (!%p224_p12), %v1036_v14  ;;  %v283_v26 = vld [vmem:[%s1342_s4 + $0x38] sm:$0xff] (!%p224_p12)  ;;  %v595_v27 = vld [vmem:[%s1342_s4 + $0x40] sm:$0xff] (!%p224_p12)  ;;  %v596_v28 = vld [vmem:[%s1342_s4 + $0x48] sm:$0xff] (!%p224_p12)  ;;  %s877_s13 = sshll.u32 (!%p224_p12), %s256_s11, 4  ;;  %s1294_s16 = scalar_lea.hbm (!%p224_p12), %s1343_s5, %s985_s10  ;;  %s1296_s13 = int_to_ptr.vmem [resolvable:$true] %s877_s13 }
  0x25   : > { %291 = vperm.xlu0 (!%p224_p12), %1026, %v277_v20   ;;  %301 = vperm.xlu1 (!%p224_p12), %1027, %v279_v21   ;;  %v1042_v29 = vld [vmem:[%s1339_s1 + $0x10] sm:$0xff] (!%p224_p12)   ;;  %v598_v31 = vld [vmem:[%s1342_s4 + $0x58] sm:$0xff] (!%p224_p12)  ;;  %v767_v32 = vld [vmem:[%s1342_s4 + $0x60] sm:$0xff] (!%p224_p12)  ;;  %s863_s22 = scalar_lea.sflag (!%p224_p12), [#allocation4], %s1199_s12  ;;  %s1046_s17 = scalar_lea.vmem (!%p224_p12), %s1296_s13, 512 }
  0x26   : > { %v597_v30 = vld [vmem:[%s1342_s4 + $0x50] sm:$0xff]  ;;  %v1043_v33 = vld [vmem:[%s1339_s1 + $0x18] sm:$0xff]   ;;  %p1047_p13 = scmp.ne.s32.totalorder %s1296_s13, %s1046_s17  ;;  %s1111_s23 = smov [#allocation3]  }
  0x27   : > { %400 = vmatpush1.bf16.msra.mxu0 %v1038_v15  ;;  %473 = vmatpush1.bf16.msra.mxu1 %v1039_v16  ;;  %s1050_s25 = sshll.u32 %s1111_s23, 4  ;;  %s1051_s25 = int_to_ptr.vmem [resolvable:$false] %s1050_s25 }
  0x28   : > { %p1048_p0 = pnand %p1047_p13, %p1180_p6  ;;  %s1052_s26 = scalar_lea.vmem %s1051_s25, 1024 }
  0x29   : > { %306 = vperm.xlu0 %1026, %v280_v22   ;;  %311 = vperm.xlu1 %1027, %v281_v23   ;;  %p1053_p2 = scmp.lt.s32.totalorder %s1296_s13, %s1051_s25  ;;  %p1054_p3 = scmp.lt.s32.totalorder %s1052_s26, %s1046_s17 }
  0x2a   : > { %963 = vmatmul.mubr.msk.bf16.vlgmr.msra.gmra.mrb[0].mxu0 %vm384_vm0, %v1040_v18  ;;  %967 = vmatmul.mubr.msk.bf16.vlgmr.msra.gmra.mrb[0].mxu1 %vm384_vm0, %v1040_v18  ;;  %p1049_p1 = pneg %p1048_p0 }
  0x2b   : > { %439 = vmatprep.mubr.bf16.mxu0 %v1110_v8  ;;  %512 = vmatprep.mubr.bf16.mxu1 %v1110_v8  ;;  %p1055_p4 = por %p1054_p3, %p1053_p2 }
  0x2d   : > { %316 = vperm.xlu0 %1026, %v282_v25   ;;  %321 = vperm.xlu1 %1027, %v283_v26   ;;  %p1056_p5 = pnand %p1055_p4, %p1049_p1 }
  0x31   : > { %601 = vperm.xlu0 %1026, %v595_v27   ;;  %606 = vperm.xlu1 %1027, %v596_v28  }
  0x32   : > { %964 = vmatmul.mubr.msk.bf16.gmra.mrb[4].mxu0 %vm384_vm0, %v1041_v24  ;;  %968 = vmatmul.mubr.msk.bf16.gmra.mrb[4].mxu1 %vm384_vm0, %v1041_v24 }
  0x33   : > { %449 = vmatprep.mubr.bf16.mxu0 %v1110_v8  ;;  %522 = vmatprep.mubr.bf16.mxu1 %v1110_v8 }
  0x35   : > { %611 = vperm.xlu0 %1026, %v597_v30   ;;  %616 = vperm.xlu1 %1027, %v598_v31  }
  0x39   : > { %770 = vperm.xlu0 %1026, %v767_v32  }
  0x3a   : > { %965 = vmatmul.mubr.msk.bf16.gmra.mrb[8].mxu0 %vm384_vm0, %v1042_v29  ;;  %969 = vmatmul.mubr.msk.bf16.gmra.mrb[8].mxu1 %vm384_vm0, %v1042_v29 }
  0x3b   : > { %459 = vmatprep.mubr.bf16.mxu0 %v1110_v8  ;;  %532 = vmatprep.mubr.bf16.mxu1 %v1110_v8 }
  0x42   : > { %966 = vmatmul.mubr.msk.bf16.gmra.mrb[12].mxu0 %vm384_vm0, %v1043_v33  ;;  %970 = vmatmul.mubr.msk.bf16.gmra.mrb[12].mxu1 %vm384_vm0, %v1043_v33 }
  0x43   : > { %668 = vmatprep.mubr.bf16.mxu0 %v1110_v8  ;;  %721 = vmatprep.mubr.bf16.mxu1 %v1110_v8 }
  0xa0   : > { %v287_v34 = vpop.permute.xlu0 %286  ;;  %v297_v36 = vpop.permute.xlu1 %296 }
  0xa4   : > { %v292_v35 = vpop.permute.xlu0 %291  ;;  %v302_v61 = vpop.permute.xlu1 %301 }
  0xa8   : > { %v307_v27 = vpop.permute.xlu0 %306  ;;  %v312_v28 = vpop.permute.xlu1 %311 }
  0xfd   : > { %v431_v37 = vpop.f32.mrb[0].mxu0  ;;  %v504_v38 = vpop.f32.mrb[0].mxu1 }
  0xfe   : > { %v432_v39 = vadd.f32 %v431_v37, %v287_v34  ;;  %v505_v40 = vadd.f32 %v504_v38, %v287_v34  ;;  %v433_v41 = vpop.f32.mrb[1].mxu0  ;;  %v506_v42 = vpop.f32.mrb[1].mxu1 }
  0xff   : > { %v434_v43 = vadd.f32 %v433_v41, %v287_v34  ;;  %v507_v44 = vadd.f32 %v506_v42, %v287_v34  ;;  %v435_v45 = vpop.f32.mrb[2].mxu0  ;;  %v508_v46 = vpop.f32.mrb[2].mxu1 }
 0x100   : > { %v436_v47 = vadd.f32 %v435_v45, %v292_v35  ;;  %v509_v48 = vadd.f32 %v508_v46, %v292_v35  ;;  %v437_v49 = vpop.f32.mrb[3].mxu0  ;;  %v510_v50 = vpop.f32.mrb[3].mxu1  ;;  %v543_v53 = vmax.f32 %v432_v39, 0.0  ;;  %v545_v54 = vmax.f32 %v505_v40, 0.0 }
 0x101   : > { %v438_v51 = vadd.f32 %v437_v49, %v292_v35  ;;  %v511_v52 = vadd.f32 %v510_v50, %v292_v35  ;;  %v544_v57 = vmax.f32 %v434_v43, 0.0  ;;  %v546_v58 = vmax.f32 %v507_v44, 0.0 }
 0x102   : > { %v547_v55 = vmax.f32 %v436_v47, 0.0  ;;  %v549_v56 = vmax.f32 %v509_v48, 0.0 }
 0x103   : > { %v548_v59 = vmax.f32 %v438_v51, 0.0  ;;  %v550_v60 = vmax.f32 %v511_v52, 0.0 }
 0x104   : > { %v575_v62 = vpack.c.bf16 %v547_v55, %v543_v53  ;;  %v577_v63 = vpack.c.bf16 %v549_v56, %v545_v54 }
 0x105   : > { %v576_v0 = vpack.c.bf16 %v548_v59, %v544_v57  ;;  %v578_v1 = vpack.c.bf16 %v550_v60, %v546_v58  ;;  %v441_v2 = vpop.f32.mrb[4].mxu0  ;;  %v514_v3 = vpop.f32.mrb[4].mxu1 }
 0x106   : > { %v442_v4 = vadd.f32 %v441_v2, %v297_v36  ;;  %v515_v5 = vadd.f32 %v514_v3, %v297_v36  ;;  %v443_v6 = vpop.f32.mrb[5].mxu0  ;;  %v516_v7 = vpop.f32.mrb[5].mxu1 }
 0x107   : > { %v444_v9 = vadd.f32 %v443_v6, %v297_v36  ;;  %v517_v10 = vadd.f32 %v516_v7, %v297_v36  ;;  %v445_v11 = vpop.f32.mrb[6].mxu0  ;;  %v518_v12 = vpop.f32.mrb[6].mxu1  ;;  %636 = vmatprep.subr.bf16.mxu0 %v576_v0  ;;  %689 = vmatprep.subr.bf16.mxu1 %v578_v1 }
 0x108   : > { %v446_v13 = vadd.f32 %v445_v11, %v302_v61  ;;  %v519_v14 = vadd.f32 %v518_v12, %v302_v61  ;;  %v447_v15 = vpop.f32.mrb[7].mxu0  ;;  %v520_v16 = vpop.f32.mrb[7].mxu1  ;;  %637 = vmatpush1.bf16.msra.mxu0 %v575_v62  ;;  %690 = vmatpush1.bf16.msra.mxu1 %v577_v63  ;;  %v551_v19 = vmax.f32 %v442_v4, 0.0  ;;  %v553_v20 = vmax.f32 %v515_v5, 0.0 }
 0x109   : > { %v448_v17 = vadd.f32 %v447_v15, %v302_v61  ;;  %v521_v18 = vadd.f32 %v520_v16, %v302_v61  ;;  %v552_v23 = vmax.f32 %v444_v9, 0.0  ;;  %v554_v24 = vmax.f32 %v517_v10, 0.0  ;;  %v317_v57 = vpop.permute.xlu0 %316  ;;  %v322_v58 = vpop.permute.xlu1 %321 }
 0x10a   : > { %v555_v21 = vmax.f32 %v446_v13, 0.0  ;;  %v557_v22 = vmax.f32 %v519_v14, 0.0 }
 0x10b   : > { %v556_v25 = vmax.f32 %v448_v17, 0.0  ;;  %v558_v26 = vmax.f32 %v521_v18, 0.0 }
 0x10c   : > { %v579_v29 = vpack.c.bf16 %v555_v21, %v551_v19  ;;  %v581_v30 = vpack.c.bf16 %v557_v22, %v553_v20 }
 0x10d   : > { %v580_v31 = vpack.c.bf16 %v556_v25, %v552_v23  ;;  %v582_v32 = vpack.c.bf16 %v558_v26, %v554_v24  ;;  %v451_v33 = vpop.f32.mrb[8].mxu0  ;;  %v524_v34 = vpop.f32.mrb[8].mxu1 }
 0x10e   : > { %v452_v35 = vadd.f32 %v451_v33, %v307_v27  ;;  %v525_v36 = vadd.f32 %v524_v34, %v307_v27  ;;  %v453_v37 = vpop.f32.mrb[9].mxu0  ;;  %v526_v38 = vpop.f32.mrb[9].mxu1 }
 0x10f   : > { %v454_v39 = vadd.f32 %v453_v37, %v307_v27  ;;  %v527_v40 = vadd.f32 %v526_v38, %v307_v27  ;;  %v455_v41 = vpop.f32.mrb[10].mxu0  ;;  %v528_v42 = vpop.f32.mrb[10].mxu1  ;;  %638 = vmatprep.subr.bf16.mxu0 %v580_v31  ;;  %691 = vmatprep.subr.bf16.mxu1 %v582_v32 }
 0x110   : > { %v456_v43 = vadd.f32 %v455_v41, %v312_v28  ;;  %v529_v44 = vadd.f32 %v528_v42, %v312_v28  ;;  %v457_v45 = vpop.f32.mrb[11].mxu0  ;;  %v530_v46 = vpop.f32.mrb[11].mxu1  ;;  %639 = vmatpush1.bf16.msra.mxu0 %v579_v29  ;;  %692 = vmatpush1.bf16.msra.mxu1 %v581_v30  ;;  %v559_v49 = vmax.f32 %v452_v35, 0.0  ;;  %v561_v50 = vmax.f32 %v525_v36, 0.0  ;;  %v1045_v29 = vld [vmem:[%s1340_s2 + $0x8] sm:$0xff]  }
 0x111   : > { %v458_v47 = vadd.f32 %v457_v45, %v312_v28  ;;  %v531_v48 = vadd.f32 %v530_v46, %v312_v28  ;;  %v560_v53 = vmax.f32 %v454_v39, 0.0  ;;  %v562_v54 = vmax.f32 %v527_v40, 0.0  ;;  %v1044_v28 = vld [vmem:[%s1340_s2] sm:$0xff]   ;;  %v602_v30 = vpop.permute.xlu0 %601  ;;  %v607_v31 = vpop.permute.xlu1 %606 }
 0x112   : > { %v563_v51 = vmax.f32 %v456_v43, 0.0  ;;  %v565_v52 = vmax.f32 %v529_v44, 0.0 }
 0x113   : > { %v564_v55 = vmax.f32 %v458_v47, 0.0  ;;  %v566_v56 = vmax.f32 %v531_v48, 0.0 }
 0x114   : > { %v583_v59 = vpack.c.bf16 %v563_v51, %v559_v49  ;;  %v585_v60 = vpack.c.bf16 %v565_v52, %v561_v50 }
 0x115   : > { %v584_v61 = vpack.c.bf16 %v564_v55, %v560_v53  ;;  %v586_v62 = vpack.c.bf16 %v566_v56, %v562_v54  ;;  %v461_v63 = vpop.f32.mrb[12].mxu0  ;;  %v534_v0 = vpop.f32.mrb[12].mxu1 }
 0x116   : > { %v462_v1 = vadd.f32 %v461_v63, %v317_v57  ;;  %v535_v2 = vadd.f32 %v534_v0, %v317_v57  ;;  %v463_v3 = vpop.f32.mrb[13].mxu0  ;;  %v536_v4 = vpop.f32.mrb[13].mxu1 }
 0x117   : > { %v464_v5 = vadd.f32 %v463_v3, %v317_v57  ;;  %v537_v6 = vadd.f32 %v536_v4, %v317_v57  ;;  %v465_v7 = vpop.f32.mrb[14].mxu0  ;;  %v538_v9 = vpop.f32.mrb[14].mxu1  ;;  %640 = vmatprep.subr.bf16.mxu0 %v584_v61  ;;  %693 = vmatprep.subr.bf16.mxu1 %v586_v62 }
 0x118   : > { %v466_v10 = vadd.f32 %v465_v7, %v322_v58  ;;  %v539_v11 = vadd.f32 %v538_v9, %v322_v58  ;;  %v467_v12 = vpop.f32.mrb[15].mxu0  ;;  %v540_v13 = vpop.f32.mrb[15].mxu1  ;;  %641 = vmatpush1.bf16.msra.mxu0 %v583_v59  ;;  %694 = vmatpush1.bf16.msra.mxu1 %v585_v60  ;;  %v567_v16 = vmax.f32 %v462_v1, 0.0  ;;  %v569_v17 = vmax.f32 %v535_v2, 0.0 }
 0x119   : > { %v468_v14 = vadd.f32 %v467_v12, %v322_v58  ;;  %v541_v15 = vadd.f32 %v540_v13, %v322_v58  ;;  %v568_v20 = vmax.f32 %v464_v5, 0.0  ;;  %v570_v21 = vmax.f32 %v537_v6, 0.0  ;;  %v612_v55 = vpop.permute.xlu0 %611  ;;  %v617_v56 = vpop.permute.xlu1 %616 }
 0x11a   : > { %v571_v18 = vmax.f32 %v466_v10, 0.0  ;;  %v573_v19 = vmax.f32 %v539_v11, 0.0 }
 0x11b   : > { %v572_v22 = vmax.f32 %v468_v14, 0.0  ;;  %v574_v23 = vmax.f32 %v541_v15, 0.0 }
 0x11c   : > { %v587_v24 = vpack.c.bf16 %v571_v18, %v567_v16  ;;  %v589_v25 = vpack.c.bf16 %v573_v19, %v569_v17 }
 0x11d   : > { %v588_v26 = vpack.c.bf16 %v572_v22, %v568_v20  ;;  %v590_v27 = vpack.c.bf16 %v574_v23, %v570_v21 }
 0x11f   : > { %642 = vmatprep.subr.bf16.mxu0 %v588_v26  ;;  %695 = vmatprep.subr.bf16.mxu1 %v590_v27  ;;  %v766_v26 = vld [vmem:[%s1341_s3] sm:$0xf]  ;;  %v771_v27 = vpop.permute.xlu0 %770 }
 0x120   : > { %643 = vmatpush1.bf16.msra.mxu0 %v587_v24  ;;  %696 = vmatpush1.bf16.msra.mxu1 %v589_v25 }
 0x123   : > { %973 = vmatmul.mubr.msk.bf16.vlgmr.msra.gmra.mrb[16].mxu0 %vm629_vm1, %v1044_v28  ;;  %975 = vmatmul.mubr.msk.bf16.vlgmr.msra.gmra.mrb[16].mxu1 %vm629_vm1, %v1044_v28 }
 0x124   : > { %678 = vmatprep.mubr.bf16.mxu0 %v1110_v8  ;;  %731 = vmatprep.mubr.bf16.mxu1 %v1110_v8 }
 0x12b   : > { %974 = vmatmul.mubr.msk.bf16.gmra.mrb[20].mxu0 %vm629_vm1, %v1045_v29  ;;  %976 = vmatmul.mubr.msk.bf16.gmra.mrb[20].mxu1 %vm629_vm1, %v1045_v29 }
 0x12c   : > { %808 = vmatprep.mubr.bf16.mxu0 %v1110_v8  ;;  %849 = vmatprep.mubr.bf16.mxu1 %v1110_v8 }
 0x1f6   : > { %v670_v32 = vpop.f32.mrb[16].mxu0  ;;  %v723_v33 = vpop.f32.mrb[16].mxu1 }
 0x1f7   : > { %v671_v34 = vadd.f32 %v670_v32, %v602_v30  ;;  %v724_v35 = vadd.f32 %v723_v33, %v602_v30  ;;  %v672_v36 = vpop.f32.mrb[17].mxu0  ;;  %v725_v37 = vpop.f32.mrb[17].mxu1 }
 0x1f8   : > { %v673_v38 = vadd.f32 %v672_v36, %v602_v30  ;;  %v726_v39 = vadd.f32 %v725_v37, %v602_v30  ;;  %v674_v40 = vpop.f32.mrb[18].mxu0  ;;  %v727_v41 = vpop.f32.mrb[18].mxu1 }
 0x1f9   : > { %v675_v42 = vadd.f32 %v674_v40, %v607_v31  ;;  %v728_v43 = vadd.f32 %v727_v41, %v607_v31  ;;  %v676_v44 = vpop.f32.mrb[19].mxu0  ;;  %v729_v45 = vpop.f32.mrb[19].mxu1  ;;  %v742_v48 = vmax.f32 %v671_v34, 0.0  ;;  %v744_v8 = vmax.f32 %v724_v35, 0.0 }
 0x1fa   : > { %v677_v46 = vadd.f32 %v676_v44, %v607_v31  ;;  %v730_v47 = vadd.f32 %v729_v45, %v607_v31  ;;  %v743_v51 = vmax.f32 %v673_v38, 0.0  ;;  %v745_v52 = vmax.f32 %v726_v39, 0.0 }
 0x1fb   : > { %v746_v49 = vmax.f32 %v675_v42, 0.0  ;;  %v748_v50 = vmax.f32 %v728_v43, 0.0 }
 0x1fc   : > { %v747_v53 = vmax.f32 %v677_v46, 0.0  ;;  %v749_v54 = vmax.f32 %v730_v47, 0.0 }
 0x1fd   : > { %v758_v57 = vpack.c.bf16 %v746_v49, %v742_v48  ;;  %v760_v58 = vpack.c.bf16 %v748_v50, %v744_v8 }
 0x1fe   : > { %v759_v59 = vpack.c.bf16 %v747_v53, %v743_v51  ;;  %v761_v60 = vpack.c.bf16 %v749_v54, %v745_v52  ;;  %v680_v61 = vpop.f32.mrb[20].mxu0  ;;  %v733_v62 = vpop.f32.mrb[20].mxu1 }
 0x1ff   : > { %v681_v63 = vadd.f32 %v680_v61, %v612_v55  ;;  %v734_v0 = vadd.f32 %v733_v62, %v612_v55  ;;  %v682_v1 = vpop.f32.mrb[21].mxu0  ;;  %v735_v2 = vpop.f32.mrb[21].mxu1 }
 0x200   : > { %v683_v3 = vadd.f32 %v682_v1, %v612_v55  ;;  %v736_v4 = vadd.f32 %v735_v2, %v612_v55  ;;  %v684_v5 = vpop.f32.mrb[22].mxu0  ;;  %v737_v6 = vpop.f32.mrb[22].mxu1  ;;  %776 = vmatprep.subr.bf16.mxu0 %v759_v59  ;;  %817 = vmatprep.subr.bf16.mxu1 %v761_v60 }
 0x201   : > { %v685_v7 = vadd.f32 %v684_v5, %v617_v56  ;;  %v738_v9 = vadd.f32 %v737_v6, %v617_v56  ;;  %v686_v10 = vpop.f32.mrb[23].mxu0  ;;  %v739_v11 = vpop.f32.mrb[23].mxu1  ;;  %777 = vmatpush1.bf16.msra.mxu0 %v758_v57  ;;  %818 = vmatpush1.bf16.msra.mxu1 %v760_v58  ;;  %v750_v14 = vmax.f32 %v681_v63, 0.0  ;;  %v752_v15 = vmax.f32 %v734_v0, 0.0 }
 0x202   : > { %v687_v12 = vadd.f32 %v686_v10, %v617_v56  ;;  %v740_v13 = vadd.f32 %v739_v11, %v617_v56  ;;  %v751_v18 = vmax.f32 %v683_v3, 0.0  ;;  %v753_v19 = vmax.f32 %v736_v4, 0.0 }
 0x203   : > { %v754_v16 = vmax.f32 %v685_v7, 0.0  ;;  %v756_v17 = vmax.f32 %v738_v9, 0.0 }
 0x204   : > { %v755_v20 = vmax.f32 %v687_v12, 0.0  ;;  %v757_v21 = vmax.f32 %v740_v13, 0.0 }
 0x205   : > { %v762_v22 = vpack.c.bf16 %v754_v16, %v750_v14  ;;  %v764_v23 = vpack.c.bf16 %v756_v17, %v752_v15 }
 0x206   : > { %v763_v24 = vpack.c.bf16 %v755_v20, %v751_v18  ;;  %v765_v25 = vpack.c.bf16 %v757_v21, %v753_v19 }
 0x208   : > { %778 = vmatprep.subr.bf16.mxu0 %v763_v24  ;;  %819 = vmatprep.subr.bf16.mxu1 %v765_v25 }
 0x209   : > { %779 = vmatpush1.bf16.msra.mxu0 %v762_v22  ;;  %820 = vmatpush1.bf16.msra.mxu1 %v764_v23 }
 0x20c   : > { %977 = vmatmul.mubr.msk.bf16.vlgmr.msra.gmra.mrb[24].mxu0 %vm384_vm0, %v766_v26  ;;  %978 = vmatmul.mubr.msk.bf16.vlgmr.msra.gmra.mrb[24].mxu1 %vm384_vm0, %v766_v26 }
 0x2df   : > { %v810_v28 = vpop.f32.mrb[24].mxu0  ;;  %v851_v29 = vpop.f32.mrb[24].mxu1 }
 0x2e0   : > { %v811_v30 = vadd.f32 %v810_v28, %v771_v27  ;;  %v852_v31 = vadd.f32 %v851_v29, %v771_v27  ;;  %v812_v32 = vpop.f32.mrb[25].mxu0  ;;  %v853_v33 = vpop.f32.mrb[25].mxu1 }
 0x2e1   : > { %v813_v34 = vadd.f32 %v812_v32, %v771_v27  ;;  %v854_v35 = vadd.f32 %v853_v33, %v771_v27  ;;  %v814_v36 = vpop.f32.mrb[26].mxu0  ;;  %v855_v37 = vpop.f32.mrb[26].mxu1 }
 0x2e2   : > { %858 = vst [vmem:[%s256_s11] sm:$0xff] %v811_v30  ;;  %860 = vst [vmem:[%s256_s11 + $0x10] sm:$0xff] %v852_v31  ;;  %v815_v38 = vpop.f32.mrb[27].mxu0  ;;  %v856_v39 = vpop.f32.mrb[27].mxu1 }
 0x2e3   : > { %859 = vst [vmem:[%s256_s11 + $0x8] sm:$0xff] %v813_v34  ;;  %861 = vst [vmem:[%s256_s11 + $0x18] sm:$0xff] %v854_v35 }
 0x2e4   : > { %1059 = shalt.err (!%p1056_p5)
}
 0x2e5   : > { %s1060_s12 = scalar_lea.hbm %s1294_s16, 512  ;;  %s1064_s7 = scalar_lea.hbm %s1343_s5, 1024 }
 0x2e6   : > { %p1061_p7 = scmp.ne.s32.totalorder %s1294_s16, %s1060_s12  ;;  %p1065_p12 = scmp.lt.u32.totalorder %s1294_s16, %s1343_s5 }
 0x2e7   : > { %p1066_p13 = scmp.lt.u32.totalorder %s1064_s7, %s1060_s12  ;;  %p1068_p1 = scmp.lt.u32.totalorder %s1060_s12, %s1294_s16 }
 0x2e8   : > { %p1062_p10 = pnand %p1061_p7, %p1180_p6 }
 0x2e9   : > { %p1067_p0 = por %p1066_p13, %p1065_p12 }
 0x2ea   : > { %p1063_p11 = pneg %p1062_p10 }
 0x2eb   : > { %p1069_p2 = por %p1068_p1, %p1067_p0 }
 0x2ed   : > { %p1070_p3 = pnand %p1069_p2, %p1063_p11 }
 0x2ef   : > { %1073 = shalt.err (!%p1070_p3)
}
 0x2f0   : > { %986 = dma.vmem_to_hbm [thread:$0]  (%p1180_p6), %s1296_s13, 512, %s1294_s16, %s863_s22  }
 0x2f1 PF: > { %s889_s10 = sand.u32 1, %s1096_s18   ;;  %p989_p4 = pnand %p944_p9, %p1184_p8 }
 0x2f2   : > { %s890_s11 = scalar_lea.sflag [#allocation4], %s889_s10 }
 0x2f3   : > { %1091 = dma.done.wait (!%p989_p4), %s890_s11, 512  }
 0x2f4   : > { %1093 = vsyncadd (!%p989_p4), %s890_s11, 4294966784  ;;  %p15_p5 = scmp.ge.s32.totalorder %s1165_s24, 4   ;;  %s1346_s18 = smov %s1100_s19 }
 0x2f5   : > { %s1347_s19 = smov %s1104_s20  ;;  %s1348_s20 = smov %s1178_s27 }
 0x2f6   : > { %s1349_s21 = smov %s1165_s24  ;;  %17 = sbr.rel (!%p15_p5) target bundleno = 3 (0x3), region = 103 }
 0x2fd   :  { %895 = vsyncpa [#allocation4], 1 }
 0x2fe   :  { %897 = vsyncpa [#allocation4 + $0x1], 1 }

</bundles_post_ra>
